<compile_context>
chip_gen: v6e
topology: v6e:2x2x1
jax: 0.10.0
libtpu: 0.0.40
codegen_flags: <defaults>
</compile_context>

<pallas_src>
import functools
import math

import jax
import jax.numpy as jnp
from jax.experimental import pallas as pl
from jax.experimental.pallas import tpu as pltpu


# ----------------------------- Pallas kernels ------------------------------ #
def _area_comm_kernel(x_ref, w_ref, b_ref, eps_ref, samp_ref, params_ref,
                      *, k_cd, m_post_var_min):
    # One block-diagonal matmul covering every area: (tile_b, sum_fac) @
    # (sum_fac, 2*k_cd) on the MXU with f32 accumulation.
    p = jnp.dot(x_ref[...], w_ref[...],
                preferred_element_type=jnp.float32) + b_ref[...]
    means = p[:, :k_cd]                                   # [mean_0 .. mean_{n-1}]
    stds = jnp.sqrt(jnp.exp(p[:, k_cd:]) + m_post_var_min)
    # Single fused lane-dense (mean || std) store + reparameterized sample.
    params_ref[...] = jnp.concatenate([means, stds], axis=1)
    samp_ref[...] = means + stds * eps_ref[...]


def _area_comm_kernel_nosample(x_ref, w_ref, b_ref, params_ref,
                               *, k_cd, m_post_var_min):
    p = jnp.dot(x_ref[...], w_ref[...],
                preferred_element_type=jnp.float32) + b_ref[...]
    stds = jnp.sqrt(jnp.exp(p[:, k_cd:]) + m_post_var_min)
    params_ref[...] = jnp.concatenate([p[:, :k_cd], stds], axis=1)


# -------------------------------- wrapper ---------------------------------- #
def _round_up(x, m):
    return ((x + m - 1) // m) * m


def _pick_batch_tile(batch, max_tile=2048):
    """Batch tile: multiple of 16 (bf16 sublane packing), capped at max_tile,
    and >= 2 grid steps for non-toy batches so "parallel" shards the batch
    tiles across both v7x TensorCores."""
    padded = _round_up(batch, 16)
    if padded <= 32:
        return padded                       # toy / per-timestep shape: 1 step
    half = _round_up((padded + 1) // 2, 16)
    return min(max_tile, half)


def _vmem_limit_bytes(tile_b, sum_fac, k_cd, mm_itemsize):
    """Explicit scoped-VMEM budget sized from the chosen tile (inputs/outputs
    double-buffered), portable across v5e/v6e/v7x defaults."""
    def padded(r, c, itemsize):
        sub = (8 * 4) // itemsize           # 8 rows f32, 16 rows bf16 per tile
        return _round_up(r, sub) * _round_up(c, 128) * itemsize

    per_step = (padded(tile_b, sum_fac, mm_itemsize)      # x tile
                + padded(tile_b, k_cd, 4)                 # eps tile
                + padded(tile_b, k_cd, 4)                 # samp tile
                + padded(tile_b, 2 * k_cd, 4))            # params tile
    resident = (padded(sum_fac, 2 * k_cd, mm_itemsize)    # block-diag W
                + padded(1, 2 * k_cd, 4))                 # bias
    total = 2 * (per_step + resident) + (2 << 20)         # dbl-buffer + headroom
    return int(min(max(total, 4 << 20), 48 << 20))


def area_communicator_forward(x_packed, w_bd, b_packed, eps=None, *,
                              com_dim, n_areas, m_post_var_min,
                              sample_posteriors=True,
                              matmul_dtype=jnp.bfloat16):
    """x_packed: (batch, sum_fac)  concatenated factor states of the other areas
    w_bd    : (sum_fac, 2*n_areas*com_dim) block-diagonal, columns permuted to
              [all means | all logvars]
    b_packed: (1, 2*n_areas*com_dim)       same column permutation
    eps     : (batch, n_areas*com_dim)     standard-normal noise (PyTorch order)
    Returns (com_samp, com_params) in the PyTorch layout."""
    batch, sum_fac = x_packed.shape
    k_cd = n_areas * com_dim
    two_k = 2 * k_cd
    assert w_bd.shape == (sum_fac, two_k)
    assert b_packed.shape == (1, two_k)

    tile_b = _pick_batch_tile(batch)
    padded_batch = pl.cdiv(batch, tile_b) * tile_b
    grid = (padded_batch // tile_b,)
    pad_rows = padded_batch - batch

    # bf16 matmul operands (f32 accumulate + f32 epilogue stay inside kernel).
    xm = x_packed.astype(matmul_dtype)
    wm = w_bd.astype(matmul_dtype)
    if pad_rows:
        xm = jnp.pad(xm, ((0, pad_rows), (0, 0)))

    # Weights / bias: constant index_map -> stay VMEM-resident across tiles.
    x_spec = pl.BlockSpec((tile_b, sum_fac), lambda i: (i, 0))
    w_spec = pl.BlockSpec((sum_fac, two_k), lambda i: (0, 0))
    b_spec = pl.BlockSpec((1, two_k), lambda i: (0, 0))
    cparams = pltpu.CompilerParams(
        dimension_semantics=("parallel",),
        vmem_limit_bytes=_vmem_limit_bytes(
            tile_b, sum_fac, k_cd, jnp.dtype(matmul_dtype).itemsize))

    if sample_posteriors:
        assert eps is not None and eps.shape == (batch, k_cd)
        eps_p = jnp.pad(eps, ((0, pad_rows), (0, 0))) if pad_rows else eps
        kernel = functools.partial(_area_comm_kernel, k_cd=k_cd,
                                   m_post_var_min=m_post_var_min)
        samp, params = pl.pallas_call(
            kernel,
            out_shape=(jax.ShapeDtypeStruct((padded_batch, k_cd), jnp.float32),
                       jax.ShapeDtypeStruct((padded_batch, two_k), jnp.float32)),
            grid=grid,
            in_specs=[x_spec, w_spec, b_spec,
                      pl.BlockSpec((tile_b, k_cd), lambda i: (i, 0))],
            out_specs=(pl.BlockSpec((tile_b, k_cd), lambda i: (i, 0)),
                       pl.BlockSpec((tile_b, two_k), lambda i: (i, 0))),
            compiler_params=cparams,
        )(xm, wm, b_packed, eps_p)
        if pad_rows:
            samp, params = samp[:batch], params[:batch]
        return samp, params

    # sample_posteriors=False: no eps DMA, no sample output computed/stored.
    kernel = functools.partial(_area_comm_kernel_nosample, k_cd=k_cd,
                               m_post_var_min=m_post_var_min)
    params = pl.pallas_call(
        kernel,
        out_shape=jax.ShapeDtypeStruct((padded_batch, two_k), jnp.float32),
        grid=grid,
        in_specs=[x_spec, w_spec, b_spec],
        out_specs=pl.BlockSpec((tile_b, two_k), lambda i: (i, 0)),
        compiler_params=cparams,
    )(xm, wm, b_packed)
    if pad_rows:
        params = params[:batch]
    com_samp = params[:, :k_cd]          # == m_means when not sampling
    return com_samp, params


# ------------------------- parameter / input setup ------------------------- #
def pack_area_params(factor_state, weights, biases, other_area_names, com_dim):
    """Pack per-area Linear layers into the fused block-diagonal form.

    Returns
      x_packed : (batch, sum_fac)                 concatenated real factor dims
      w_bd     : (sum_fac, 2*n_areas*com_dim)     block-diagonal; columns
                 pre-permuted to [mean_0..mean_{n-1} | logvar_0..logvar_{n-1}]
      b_packed : (1, 2*n_areas*com_dim)           same column permutation
    """
    n_areas = len(other_area_names)
    k_cd = n_areas * com_dim
    facs = [weights[n].shape[0] for n in other_area_names]
    sum_fac = sum(facs)

    x_packed = jnp.concatenate([factor_state[n] for n in other_area_names],
                               axis=1)
    w_bd = jnp.zeros((sum_fac, 2 * k_cd), jnp.float32)
    b_packed = jnp.zeros((1, 2 * k_cd), jnp.float32)
    row = 0
    for ia, name in enumerate(other_area_names):
        w = weights[name]                 # (fac, 2*com_dim), x @ W form
        b = biases[name]                  # (2*com_dim,)
        fac = facs[ia]
        cm = slice(ia * com_dim, (ia + 1) * com_dim)
        cl = slice(k_cd + ia * com_dim, k_cd + (ia + 1) * com_dim)
        w_bd = w_bd.at[row:row + fac, cm].set(w[:, :com_dim])
        w_bd = w_bd.at[row:row + fac, cl].set(w[:, com_dim:])
        b_packed = b_packed.at[0, cm].set(b[:com_dim])
        b_packed = b_packed.at[0, cl].set(b[com_dim:])
        row += fac
    return x_packed, w_bd, b_packed


def build_params_and_inputs():
    area_names = ["A", "B", "C"]
    self_name = "A"
    other_area_names = [a for a in area_names if a != self_name]  # ["B", "C"]
    com_dim = 8
    total_fac_dim_dict = {"A": 16, "B": 12, "C": 20}
    m_post_var_min = 1e-4
    batch = 4

    key = jax.random.PRNGKey(0)
    keys = jax.random.split(key, 16)

    factor_state = {}
    for i, name in enumerate(area_names):
        factor_state[name] = jax.random.normal(
            keys[i], (batch, total_fac_dim_dict[name]), dtype=jnp.float32)

    weights, biases = {}, {}
    for ia, name in enumerate(other_area_names):
        fac = total_fac_dim_dict[name]
        bound = 1.0 / math.sqrt(fac)
        wk, bk = jax.random.split(keys[8 + ia])
        weights[name] = jax.random.uniform(
            wk, (fac, 2 * com_dim), minval=-bound, maxval=bound,
            dtype=jnp.float32)            # stored as W^T (x @ W form)
        biases[name] = jax.random.uniform(
            bk, (2 * com_dim,), minval=-bound, maxval=bound, dtype=jnp.float32)

    k_cd = com_dim * len(other_area_names)
    eps = jax.random.normal(keys[15], (batch, k_cd), dtype=jnp.float32)

    hps = dict(com_dim=com_dim, m_post_var_min=m_post_var_min,
               other_area_names=other_area_names,
               total_fac_dim_dict=total_fac_dim_dict)
    return factor_state, weights, biases, eps, hps


def reference_forward(factor_state, weights, biases, eps, hps,
                      sample_posteriors=True):
    """Pure-JAX (f32) reference of the PyTorch forward."""
    com_dim = hps["com_dim"]
    means, stds = [], []
    for name in hps["other_area_names"]:
        params = factor_state[name] @ weights[name] + biases[name]
        means.append(params[:, :com_dim])
        stds.append(jnp.sqrt(jnp.exp(params[:, com_dim:]) +
                             hps["m_post_var_min"]))
    m_means = jnp.concatenate(means, axis=1)
    m_stds = jnp.concatenate(stds, axis=1)
    com_samp = m_means + m_stds * eps if sample_posteriors else m_means
    com_params = jnp.concatenate([m_means, m_stds], axis=1)
    return com_samp, com_params


if __name__ == "__main__":
    factor_state, weights, biases, eps, hps = build_params_and_inputs()
    names = hps["other_area_names"]
    com_dim = hps["com_dim"]
    n_areas = len(names)
    mpvm = hps["m_post_var_min"]

    x_packed, w_bd, b_packed = pack_area_params(
        factor_state, weights, biases, names, com_dim)

    ref_samp, ref_params = reference_forward(
        factor_state, weights, biases, eps, hps, sample_posteriors=True)

    # 1) f32-matmul path: bit-tight vs. the f32 reference.
    samp, params = area_communicator_forward(
        x_packed, w_bd, b_packed, eps, com_dim=com_dim, n_areas=n_areas,
        m_post_var_min=mpvm, sample_posteriors=True, matmul_dtype=jnp.float32)
    jax.block_until_ready((samp, params))
    assert jnp.allclose(samp, ref_samp, rtol=1e-5, atol=1e-5)
    assert jnp.allclose(params, ref_params, rtol=1e-5, atol=1e-5)

    # 2) bf16-matmul path (perf default): halves HBM/VMEM traffic on x / W.
    samp_bf, params_bf = area_communicator_forward(
        x_packed, w_bd, b_packed, eps, com_dim=com_dim, n_areas=n_areas,
        m_post_var_min=mpvm, sample_posteriors=True, matmul_dtype=jnp.bfloat16)
    jax.block_until_ready((samp_bf, params_bf))
    assert jnp.allclose(samp_bf, ref_samp, rtol=5e-2, atol=5e-2)
    assert jnp.allclose(params_bf, ref_params, rtol=5e-2, atol=5e-2)

    # 3) sample_posteriors=False: no eps DMA, no sample output.
    ref_samp_ns, ref_params_ns = reference_forward(
        factor_state, weights, biases, eps, hps, sample_posteriors=False)
    samp_ns, params_ns = area_communicator_forward(
        x_packed, w_bd, b_packed, None, com_dim=com_dim, n_areas=n_areas,
        m_post_var_min=mpvm, sample_posteriors=False, matmul_dtype=jnp.float32)
    jax.block_until_ready((samp_ns, params_ns))
    assert jnp.allclose(samp_ns, ref_samp_ns, rtol=1e-5, atol=1e-5)
    assert jnp.allclose(params_ns, ref_params_ns, rtol=1e-5, atol=1e-5)

    print("KERNEL_OK")
</pallas_src>

<mosaic_0001>
module attributes {stable_mosaic.version = 11 : i64} {
  func.func @_area_comm_kernel(%arg0: i32, %arg1: memref<16x32xf32, #tpu.memory_space<vmem>>, %arg2: memref<32x32xf32, #tpu.memory_space<vmem>>, %arg3: memref<1x32xf32, #tpu.memory_space<vmem>>, %arg4: memref<16x16xf32, #tpu.memory_space<vmem>>, %arg5: memref<16x16xf32, #tpu.memory_space<vmem>>, %arg6: memref<16x32xf32, #tpu.memory_space<vmem>>) attributes {dimension_semantics = [#tpu.dimension_semantics<parallel>], iteration_bounds = array<i64: 1>, scalar_prefetch = 0 : i64, scratch_operands = 0 : i64, tpu.core_type = #tpu.core_type<tc>, window_params = [{transform_indices = @transform_0, window_bounds = array<i64: 16, 32>}, {pipeline_mode = #tpu.pipeline_mode<synchronous>, transform_indices = @transform_1, window_bounds = array<i64: 32, 32>}, {pipeline_mode = #tpu.pipeline_mode<synchronous>, transform_indices = @transform_2, window_bounds = array<i64: 1, 32>}, {transform_indices = @transform_3, window_bounds = array<i64: 16, 16>}, {transform_indices = @transform_4, window_bounds = array<i64: 16, 16>}, {transform_indices = @transform_5, window_bounds = array<i64: 16, 32>}]} {
    %c0 = arith.constant 0 : index
    %c0_0 = arith.constant 0 : index
    %0 = vector.load %arg1[%c0, %c0_0] : memref<16x32xf32, #tpu.memory_space<vmem>>, vector<16x32xf32>
    %c0_1 = arith.constant 0 : index
    %c0_2 = arith.constant 0 : index
    %1 = vector.load %arg2[%c0_1, %c0_2] : memref<32x32xf32, #tpu.memory_space<vmem>>, vector<32x32xf32>
    %cst = arith.constant dense<0.000000e+00> : vector<16x32xf32>
    %2 = tpu.matmul %0, %1, %cst {dimension_numbers = #tpu.dot_dimension_numbers<[1], [0], [0], [1], [0, 0, 1, 1], [], []>} : vector<16x32xf32>, vector<32x32xf32>, vector<16x32xf32> -> vector<16x32xf32>
    %c0_3 = arith.constant 0 : index
    %c0_4 = arith.constant 0 : index
    %3 = vector.load %arg3[%c0_3, %c0_4] : memref<1x32xf32, #tpu.memory_space<vmem>>, vector<1x32xf32>
    %4 = vector.broadcast %3 : vector<1x32xf32> to vector<16x32xf32>
    %5 = arith.addf %2, %4 : vector<16x32xf32>
    %6 = vector.extract_strided_slice %5 {offsets = [0, 0], sizes = [16, 16], strides = [1, 1]} : vector<16x32xf32> to vector<16x16xf32>
    %7 = vector.extract_strided_slice %5 {offsets = [0, 16], sizes = [16, 16], strides = [1, 1]} : vector<16x32xf32> to vector<16x16xf32>
    %8 = math.exp %7 : vector<16x16xf32>
    %cst_5 = arith.constant 9.99999974E-5 : f32
    %9 = vector.broadcast %cst_5 : f32 to vector<16x16xf32>
    %10 = arith.addf %8, %9 : vector<16x16xf32>
    %11 = math.sqrt %10 : vector<16x16xf32>
    %12 = tpu.concatenate %6, %11 in 1 : vector<16x16xf32>, vector<16x16xf32> -> vector<16x32xf32>
    %c0_6 = arith.constant 0 : index
    %c0_7 = arith.constant 0 : index
    %13 = vector.load %arg6[%c0_6, %c0_7] : memref<16x32xf32, #tpu.memory_space<vmem>>, vector<16x32xf32>
    tpu.vector_store %arg6[%c0_6, %c0_7], %12 {strides = array<i32>} : memref<16x32xf32, #tpu.memory_space<vmem>>, vector<16x32xf32>,
    %c0_8 = arith.constant 0 : index
    %c0_9 = arith.constant 0 : index
    %14 = vector.load %arg4[%c0_8, %c0_9] : memref<16x16xf32, #tpu.memory_space<vmem>>, vector<16x16xf32>
    %15 = arith.mulf %11, %14 : vector<16x16xf32>
    %16 = arith.addf %6, %15 : vector<16x16xf32>
    %c0_10 = arith.constant 0 : index
    %c0_11 = arith.constant 0 : index
    %17 = vector.load %arg5[%c0_10, %c0_11] : memref<16x16xf32, #tpu.memory_space<vmem>>, vector<16x16xf32>
    tpu.vector_store %arg5[%c0_10, %c0_11], %16 {strides = array<i32>} : memref<16x16xf32, #tpu.memory_space<vmem>>, vector<16x16xf32>,
    return
  }
  func.func @transform_0(%arg0: i32) -> (i32, i32) {
    %c0_i32 = arith.constant 0 : i32
    %c0_i32_0 = arith.constant 0 : i32
    return %arg0, %c0_i32 : i32, i32
  }
  func.func @transform_1(%arg0: i32) -> (i32, i32) {
    %c0_i32 = arith.constant 0 : i32
    %c0_i32_0 = arith.constant 0 : i32
    %c0_i32_1 = arith.constant 0 : i32
    return %c0_i32, %c0_i32_0 : i32, i32
  }
  func.func @transform_2(%arg0: i32) -> (i32, i32) {
    %c0_i32 = arith.constant 0 : i32
    %c0_i32_0 = arith.constant 0 : i32
    %c0_i32_1 = arith.constant 0 : i32
    return %c0_i32, %c0_i32_0 : i32, i32
  }
  func.func @transform_3(%arg0: i32) -> (i32, i32) {
    %c0_i32 = arith.constant 0 : i32
    %c0_i32_0 = arith.constant 0 : i32
    return %arg0, %c0_i32 : i32, i32
  }
  func.func @transform_4(%arg0: i32) -> (i32, i32) {
    %c0_i32 = arith.constant 0 : i32
    %c0_i32_0 = arith.constant 0 : i32
    return %arg0, %c0_i32 : i32, i32
  }
  func.func @transform_5(%arg0: i32) -> (i32, i32) {
    %c0_i32 = arith.constant 0 : i32
    %c0_i32_0 = arith.constant 0 : i32
    return %arg0, %c0_i32 : i32, i32
  }
}

</mosaic_0001>

<bundles_post_ra>
// kernel: tpu_custom_call.1
= control target key start
LH: loop header
LB: loop body
LE: loop exit
PB: predicated region body
PF: predicated region fallthrough
CT: control target
= control target key end

     0   :  { %11 = vsyncpa [#allocation3], 0  ;;  %s465_s0 = inlined_call_operand.hbm [shape: f32[16,32], index: 0, kind: input, shape index: {}]   ;;  %s466_s1 = inlined_call_operand.hbm [shape: f32[32,32], index: 1, kind: input, shape index: {}]   ;;  %s467_s2 = inlined_call_operand.vmem [shape: f32[1,32], index: 2, kind: input, shape index: {}]   ;;  %s468_s3 = inlined_call_operand.hbm [shape: f32[16,16], index: 3, kind: input, shape index: {}]   ;;  %s469_s4 = inlined_call_operand.hbm [shape: f32[16,16], index: 4, kind: output, shape index: {0}]   ;;  %s470_s5 = inlined_call_operand.hbm [shape: f32[16,32], index: 5, kind: output, shape index: {1}]  }
   0x1   :  { %12 = vsyncpa [#allocation6], 0 }
   0x2   :  { %13 = vsyncpa [#allocation4], 0 }
   0x3   :  { %14 = vsyncpa [#allocation10], 0  ;;  %s385_s18 = smov [#allocation5]   ;;  %s386_s20 = smov [#allocation2]  }
   0x4   :  { %s32_s19 = sshll.u32 %s385_s18, 4  ;;  %s20_s21 = sshll.u32 %s386_s20, 4  ;;  %s33_s19 = int_to_ptr.vmem [resolvable:$true] %s32_s19  ;;  %s21_s21 = int_to_ptr.vmem [resolvable:$true] %s20_s21 }
   0x5   :  { %s285_s22 = scalar_lea.vmem %s33_s19, 512  ;;  %p290_p1 = scmp.lt.s32.totalorder %s33_s19, %s33_s19 }
   0x6   :  { %p286_p0 = scmp.ne.s32.totalorder %s33_s19, %s285_s22  ;;  %p291_p2 = scmp.lt.s32.totalorder %s285_s22, %s285_s22 }
   0x8   :  { %p292_p3 = por %p291_p2, %p290_p1 }
   0xa   :  { %p293_p4 = pnand %p292_p3, %p286_p0 }
   0xc   :  { %296 = shalt.err (!%p293_p4)
}
   0xd   :  { %s387_s23 = smov 128   ;;  %s388_s24 = smov 8  }
   0xe   :  { %38 = dma.hbm_to_vmem [thread:$0]  %s466_s1, 512, %s33_s19, [#allocation6], %s387_s23, %s387_s23, %s388_s24  }
   0xf   :  { %s305_s27 = scalar_lea.vmem %s21_s21, 256  ;;  %p310_p6 = scmp.lt.s32.totalorder %s21_s21, %s21_s21 }
  0x10   :  { %p306_p5 = scmp.ne.s32.totalorder %s21_s21, %s305_s27  ;;  %p311_p7 = scmp.lt.s32.totalorder %s305_s27, %s305_s27 }
  0x12   :  { %p312_p8 = por %p311_p7, %p310_p6 }
  0x14   :  { %p313_p9 = pnand %p312_p8, %p306_p5 }
  0x16   :  { %316 = shalt.err (!%p313_p9)
}
  0x17   :  { %26 = dma.hbm_to_vmem [thread:$0]  %s465_s0, 256, %s21_s21, [#allocation3], %s387_s23, %s387_s23, %s388_s24  }
  0x18   :  { %s389_s30 = smov [#allocation7]  }
  0x19   :  { %s46_s6 = sshll.u32 %s389_s30, 4  ;;  %s47_s6 = int_to_ptr.vmem [resolvable:$true] %s46_s6 }
  0x1a   :  { %s325_s7 = scalar_lea.vmem %s47_s6, 256  ;;  %p330_p11 = scmp.lt.s32.totalorder %s47_s6, %s47_s6 }
  0x1b   :  { %p326_p10 = scmp.ne.s32.totalorder %s47_s6, %s325_s7  ;;  %p331_p12 = scmp.lt.s32.totalorder %s325_s7, %s325_s7 }
  0x1d   :  { %p332_p13 = por %p331_p12, %p330_p11 }
  0x1f   :  { %p333_p0 = pnand %p332_p13, %p326_p10 }
  0x21   :  { %336 = shalt.err (!%p333_p0)
}
  0x22   :  { %52 = dma.hbm_to_vmem [thread:$0]  %s468_s3, 256, %s47_s6, [#allocation6], %s387_s23, %s387_s23, %s388_s24  }
  0x23   :  { %377 = dma.done.wait [#allocation3], 256  }
  0x24   :  { %378 = vsyncadd [#allocation3], 4294967040 }
  0x25   :  { %379 = dma.done.wait [#allocation6], 768  }
  0x26   :  { %380 = vsyncadd [#allocation6], 4294966528  ;;  %vm75_vm0 = vcmask 261120   ;;  %v67_v0 = vld [vmem:[#allocation5 + $0x18] sm:$0xff]  ;;  %v66_v1 = vld [vmem:[#allocation5 + $0x10] sm:$0xff]  ;;  %s390_s0 = smov 16  }
  0x27   :  { %249 = vmatprep.subr.mxu0 %v67_v0  ;;  %v62_v2 = vld [vmem:[#allocation2] sm:$0xff]  ;;  %v65_v3 = vld [vmem:[#allocation5 + $0x8] sm:$0xff]  ;;  %v182_v4 = vld [vmem:[#allocation7] sm:$0xff]  ;;  %vm177_vm1 = vcmask 130048   ;;  %s392_s11 = smov 112  }
  0x28   :  { %250 = vmatpush3.msra.mxu0 %v67_v0  ;;  %257 = vmatprep.mubr.msk.f32.mxu0 %vm75_vm0, %v62_v2  ;;  %v64_v5 = vld [vmem:[#allocation5] sm:$0xff]  ;;  %v183_v6 = vld [vmem:[#allocation7 + $0x8] sm:$0xff]  ;;  %v63_v7 = vld [vmem:[#allocation2 + $0x8] sm:$0xff] }
  0x29   :  { %251 = vmatprep.subr.mxu0 %v66_v1  ;;  %186 = vrot.lane.b32.xlu0 %v182_v4, %s390_s0  ;;  %v240_v8 = vld [vmem:[%s467_s2] ss:$0 sm:$0xff]  ;;  %s391_s2 = smov [#allocation9]  }
  0x2a   :  { %252 = vmatpush3.msra.mxu0 %v66_v1  ;;  %s223_s10 = sshll.u32 %s391_s2, 4  ;;  %s224_s10 = int_to_ptr.vmem [resolvable:$true] %s223_s10 }
  0x2b   :  { %253 = vmatprep.subr.mxu0 %v65_v3  ;;  %s337_s12 = scalar_lea.vmem %s224_s10, 256  ;;  %p342_p2 = scmp.lt.s32.totalorder %s224_s10, %s224_s10 }
  0x2c   :  { %254 = vmatpush3.msra.mxu0 %v65_v3  ;;  %p338_p1 = scmp.ne.s32.totalorder %s224_s10, %s337_s12  ;;  %p343_p3 = scmp.lt.s32.totalorder %s337_s12, %s337_s12 }
  0x2d   :  { %255 = vmatprep.subr.mxu0 %v64_v5  ;;  %188 = vrot.lane.b32.xlu0 %v183_v6, %s390_s0 }
  0x2e   :  { %256 = vmatpush3.msra.mxu0 %v64_v5  ;;  %p344_p4 = por %p343_p3, %p342_p2 }
  0x2f   :  { %258 = vmatmul.mubr.msk.f32.vlgmr.msra.gmra.mxu0 %vm75_vm0, %v63_v7 }
  0x30   :  { %p345_p5 = pnand %p344_p4, %p338_p1 }
  0x9b   :  { %v187_v22 = vpop.permute.xlu0 %186 }
  0x9f   :  { %v189_v33 = vpop.permute.xlu0 %188 }
  0xef   :  { %v259_v9 = vpop.f32.mrf.mxu0 }
  0xf0   :  { %v154_v10 = vadd.f32 %v259_v9, %v240_v8 }
  0xf1   :  { %v148_v11 = vpop.f32.mrf.mxu0 }
  0xf2   :  { %v159_v12 = vmul.f32 1.442695, %v154_v10  ;;  %v149_v13 = vadd.f32 %v240_v8, %v148_v11 }
  0xf4   :  { %269 = vpow2.f32 %v159_v12  ;;  %v157_v14 = vmul.f32 1.442695, %v149_v13 }
  0xf6   :  { %271 = vpow2.f32 %v157_v14 }
 0x101   :  { %v270_v15 = vpop.eup %269 }
 0x102   :  { %v162_v16 = vadd.f32 0.0001, %v270_v15 }
 0x103   :  { %v272_v17 = vpop.eup %271 }
 0x104   :  { %v161_v18 = vadd.f32 0.0001, %v272_v17  ;;  %273 = vrsqrt.f32 %v162_v16  ;;  %vm172_vm2 = vcmp.eq.f32.partialorder %v162_v16, inf  ;;  %v175_v23 = vand.u32 2147483648, %v162_v16 }
 0x105   :  { %vm174_vm3 = vcmp.eq.f32.partialorder %v162_v16, 0.0 }
 0x106   :  { %275 = vrsqrt.f32 %v161_v18  ;;  %vm165_vm4 = vcmp.eq.f32.partialorder %v161_v18, inf  ;;  %v168_v26 = vand.u32 2147483648, %v161_v18  ;;  %vm167_vm5 = vcmp.eq.f32.partialorder %v161_v18, 0.0 }
 0x111   :  { %v274_v19 = vpop.eup %273 }
 0x112   :  { %v171_v20 = vmul.f32 %v274_v19, %v162_v16 }
 0x113   :  { %v276_v21 = vpop.eup %275 }
 0x114   :  { %v164_v24 = vmul.f32 %v276_v21, %v161_v18  ;;  %v173_v25 = vsel %vm172_vm2, %v162_v16, %v171_v20 }
 0x115   :  { %v176_v27 = vsel %vm174_vm3, %v175_v23, %v173_v25 }
 0x116   :  { %v166_v28 = vsel %vm165_vm4, %v161_v18, %v164_v24  ;;  %v179_v29 = vsel %vm177_vm1, %v154_v10, %v176_v27 }
 0x117   :  { %v169_v30 = vsel %vm167_vm5, %v168_v26, %v166_v28  ;;  %181 = vst.msk [vmem:[#allocation9 + $0x8] sm:$0xff] %vm75_vm0, %v179_v29 }
 0x118   :  { %v178_v31 = vsel %vm177_vm1, %v149_v13, %v169_v30  ;;  %v192_v32 = vmul.f32 %v187_v22, %v169_v30 }
 0x119   :  { %180 = vst.msk [vmem:[#allocation9] sm:$0xff] %vm75_vm0, %v178_v31 }
 0x11a   :  { %196 = vrot.lane.b32.xlu1 %v192_v32, %s392_s11 }
 0x11b   :  { %348 = shalt.err (!%p345_p5)
}
 0x11c   :  { %229 = dma.vmem_to_hbm [thread:$0]  %s224_s10, 256, %s470_s5, [#allocation10], %s387_s23, %s387_s23, %s388_s24   ;;  %v193_v34 = vmul.f32 %v189_v33, %v176_v27 }
 0x11d   :  { %s393_s15 = smov [#allocation8]  }
 0x11e   :  { %198 = vrot.lane.b32.xlu1 %v193_v34, %s392_s11  ;;  %s211_s16 = sshll.u32 %s393_s15, 4  ;;  %s212_s16 = int_to_ptr.vmem [resolvable:$true] %s211_s16 }
 0x11f   :  { %s357_s17 = scalar_lea.vmem %s212_s16, 256  ;;  %p362_p7 = scmp.lt.s32.totalorder %s212_s16, %s212_s16 }
 0x120   :  { %p358_p6 = scmp.ne.s32.totalorder %s212_s16, %s357_s17  ;;  %p363_p8 = scmp.lt.s32.totalorder %s357_s17, %s357_s17 }
 0x122   :  { %p364_p9 = por %p363_p8, %p362_p7 }
 0x124   :  { %p365_p10 = pnand %p364_p9, %p358_p6 }
 0x18c   :  { %v197_v35 = vpop.permute.xlu1 %196 }
 0x18d   :  { %v202_v36 = vadd.f32 %v197_v35, %v149_v13 }
 0x18f   :  { %204 = vst.msk [vmem:[#allocation8] sm:$0xff] %vm177_vm1, %v202_v36 }
 0x190   :  { %v199_v37 = vpop.permute.xlu1 %198 }
 0x191   :  { %v203_v38 = vadd.f32 %v199_v37, %v154_v10 }
 0x193   :  { %205 = vst.msk [vmem:[#allocation8 + $0x8] sm:$0xff] %vm177_vm1, %v203_v38 }
 0x194   :  { %368 = shalt.err (!%p365_p10)
}
 0x195   :  { %217 = dma.vmem_to_hbm [thread:$0]  %s212_s16, 256, %s469_s4, [#allocation4], %s387_s23, %s387_s23, %s388_s24  }
 0x196   :  { %381 = dma.done.wait [#allocation4], 256  }
 0x197   :  { %382 = vsyncadd [#allocation4], 4294967040 }
 0x198   :  { %383 = dma.done.wait [#allocation10], 256  }
 0x199   :  { %384 = vsyncadd [#allocation10], 4294967040 }
 0x19a   :  { %236 = vsyncpa [#allocation3], 1 }
 0x19b   :  { %237 = vsyncpa [#allocation6], 1 }
 0x19c   :  { %238 = vsyncpa [#allocation4], 1 }
 0x19d   :  { %239 = vsyncpa [#allocation10], 1 }

</bundles_post_ra>
